<compile_context>
chip_gen: v6e
topology: v6e:2x2x1
jax: 0.10.0
libtpu: 0.0.40
codegen_flags: <defaults>
</compile_context>

<pallas_src>
import functools
import numpy as np
import jax
import jax.numpy as jnp
from jax.experimental import pallas as pl
from jax.experimental.pallas import tpu as pltpu


def _leaky(x):
    # LeakyReLU(negative_slope=0.2)
    return jnp.where(x >= 0, x, 0.2 * x)


def _round_up(x, m):
    return ((x + m - 1) // m) * m


def _pad2(a, rows, cols):
    return jnp.pad(a, ((0, rows - a.shape[0]), (0, cols - a.shape[1])))


def _narrow_matmul(a, w, n_active):
    """a:(T,Cpad) x w:(Cpad,D), contracting only the first n_active channels.

    Tiny contractions (<= 8) are done as VPU broadcast multiply-adds instead of
    wasting a full 128-deep MXU pass; larger ones go to the MXU in bf16."""
    if n_active <= 8:
        acc = a[:, 0:1] * w[0:1, :]
        for c in range(1, n_active):
            acc = acc + a[:, c:c + 1] * w[c:c + 1, :]
        return acc
    return jnp.dot(a.astype(jnp.bfloat16), w.astype(jnp.bfloat16),
                   preferred_element_type=jnp.float32)


# ---------------------------------------------------------------------------
# Kernel 1: fused per-point table   xf = [ LReLU(feats @ W1 + b1) | pos @ Wd1 ]
# Grid: (B, N // TILE_N), both axes parallel.
# ---------------------------------------------------------------------------
def proj_kernel(feats_ref, pos_ref, w1_ref, b1_ref, wd1_ref, xf_ref,
                *, d_points, dmP):
    x = _leaky(_narrow_matmul(feats_ref[...], w1_ref[...], d_points) + b1_ref[...])
    pp = _narrow_matmul(pos_ref[...], wd1_ref[...], 3)      # 3-wide -> VPU MACs
    xf_ref[:, 0:dmP] = x
    xf_ref[:, dmP:2 * dmP] = pp


# ---------------------------------------------------------------------------
# Shared post-gather attention math (runs on values, not refs).
#   xq/ppq:  (T, dmP) f32   query-side x and pos-projection rows
#   x_nb/pp_nb: (T, K, dmP) f32 gathered neighbour rows
#   feats_res: (T, dpP) f32 lane-dense residual
#   w*: matmul weights (bf16 -> native MXU path), b*: f32 biases
# ---------------------------------------------------------------------------
def _attn_core(xq, ppq, x_nb, pp_nb, feats_res,
               wq, wk, wv, bd1, wd2, bd2, wg1, bg1, wg2, bg2, w2, b2):
    def mm(a, w):
        return jnp.dot(a.astype(w.dtype), w, preferred_element_type=jnp.float32)

    def mm3(a, w):
        t, k, d = a.shape
        return mm(a.reshape(t * k, d), w).reshape(t, k, w.shape[-1])

    q = mm(xq, wq)                                           # (T, dm)
    k_nb = mm3(x_nb, wk)                                     # (T, K, dm)
    v_nb = mm3(x_nb, wv)

    # fc_delta: LReLU(rel @ Wd1 + bd1) == LReLU(pp_q - pp_neighbour + bd1)
    h = _leaky(ppq[:, None, :] - pp_nb + bd1)
    pos_enc = _leaky(mm3(h, wd2) + bd2)

    # fc_gamma on (q - k + pos_enc); softmax scale is pre-folded into wg2/bg2
    ai = q[:, None, :] - k_nb + pos_enc
    g = _leaky(mm3(ai, wg1) + bg1)
    logits = _leaky(mm3(g, wg2) + bg2)

    # per-channel softmax over the K neighbours (exact reciprocal: tiny tensor)
    m = jnp.max(logits, axis=1, keepdims=True)
    e = jnp.exp(logits - m)
    s = jnp.sum(e, axis=1, keepdims=True)
    attn = e * (1.0 / s)

    res = jnp.sum(attn * (v_nb + pos_enc), axis=1)           # (T, dm)
    return _leaky(mm(res, w2) + b2) + feats_res               # (T, dpP)


# ---------------------------------------------------------------------------
# Kernel 2a (large N): SMEM-index row gather from the VMEM-resident fused table.
# One fused row copy per (query, neighbour) pair.
# ---------------------------------------------------------------------------
def attn_gather_kernel(idx_ref,                          # scalar-prefetch SMEM (B*N*K,)
                       feats_ref, xf_ref,
                       wq_ref, wk_ref, wv_ref,
                       bd1_ref, wd2_ref, bd2_ref,
                       wg1_ref, bg1_ref, wg2_ref, bg2_ref,
                       w2_ref, b2_ref,
                       out_ref,
                       gbuf,                             # (TILE_N, K, 2*dmP) f32 scratch
                       *, N, K, TILE_N, dmP):
    b = pl.program_id(0)
    t = pl.program_id(1)
    base = (b * N + t * TILE_N) * K

    def gather_row(i, carry):
        rb = base + i * K
        for j in range(K):                               # K static -> unrolled
            nbr = idx_ref[rb + j]
            gbuf[i, j:j + 1, :] = xf_ref[pl.ds(nbr, 1), :]
        return carry

    jax.lax.fori_loop(0, TILE_N, gather_row, 0)

    row0 = pl.multiple_of(t * TILE_N, TILE_N)
    xf_q = xf_ref[pl.ds(row0, TILE_N), :]                # query rows of resident table
    g = gbuf[...]
    out_ref[...] = _attn_core(
        xf_q[:, 0:dmP], xf_q[:, dmP:2 * dmP],
        g[:, :, 0:dmP], g[:, :, dmP:2 * dmP],
        feats_ref[...],
        wq_ref[...], wk_ref[...], wv_ref[...],
        bd1_ref[...], wd2_ref[...], bd2_ref[...],
        wg1_ref[...], bg1_ref[...], wg2_ref[...], bg2_ref[...],
        w2_ref[...], b2_ref[...])


# ---------------------------------------------------------------------------
# Kernel 2b (small N <= 512): fully vectorised one-hot MXU gather (no scalar loop).
# ---------------------------------------------------------------------------
def attn_onehot_kernel(idx_ref, feats_ref, xf_ref,
                       wq_ref, wk_ref, wv_ref,
                       bd1_ref, wd2_ref, bd2_ref,
                       wg1_ref, bg1_ref, wg2_ref, bg2_ref,
                       w2_ref, b2_ref,
                       out_ref,
                       *, N, K, TILE_N, dmP):
    t = pl.program_id(1)
    nbr = idx_ref[...]                                                  # (TILE_N, K)
    iota = jax.lax.broadcasted_iota(jnp.int32, (TILE_N, K, N), 2)
    onehot = (nbr[:, :, None] == iota).astype(jnp.float32)              # (TILE_N, K, N)
    xf = xf_ref[...]                                                    # (N, 2*dmP)
    gathered = jnp.dot(onehot.reshape(TILE_N * K, N), xf,
                       preferred_element_type=jnp.float32)
    gathered = gathered.reshape(TILE_N, K, 2 * dmP)

    row0 = pl.multiple_of(t * TILE_N, TILE_N)
    xf_q = xf_ref[pl.ds(row0, TILE_N), :]
    out_ref[...] = _attn_core(
        xf_q[:, 0:dmP], xf_q[:, dmP:2 * dmP],
        gathered[:, :, 0:dmP], gathered[:, :, dmP:2 * dmP],
        feats_ref[...],
        wq_ref[...], wk_ref[...], wv_ref[...],
        bd1_ref[...], wd2_ref[...], bd2_ref[...],
        wg1_ref[...], bg1_ref[...], wg2_ref[...], bg2_ref[...],
        w2_ref[...], b2_ref[...])


# ---------------------------------------------------------------------------
# Wrapper
# ---------------------------------------------------------------------------
def point_transformer_block(feats, pos, knn_idx, params, *,
                            matmul_dtype=jnp.bfloat16, onehot_max_n=512):
    B, N, d_points = feats.shape
    K = knn_idx.shape[-1]
    d_model = params["wq"].shape[0]
    dmP = _round_up(d_model, 128)            # lane-dense model channels
    dpP = _round_up(d_points, 128)           # lane-dense residual / output channels
    f32 = jnp.float32

    # Physical VMEM (drives tile size + scoped-limit choices); conservative v7x default.
    try:
        phys_vmem = int(pltpu.get_tpu_info().vmem_capacity_bytes)
    except Exception:
        phys_vmem = 64 << 20

    if N <= 128:
        TILE_N = N
    else:
        assert N % 128 == 0, "N must be a multiple of 128 (or <= 128)"
        # v5e/v6e (128 MiB VMEM): 256-point tiles amortise per-step overhead;
        # keep 128 on v7x-class parts (64 MiB VMEM).
        TILE_N = 256 if (N % 256 == 0 and phys_vmem >= (96 << 20)) else 128
    T = N // TILE_N

    # PyTorch: softmax(attn / sqrt(k.size(-1))).  After the (0,3,2,1) permute the
    # last dim of k is N (number of points), so the scale is 1/sqrt(N).
    scale = float(1.0 / np.sqrt(N))

    wdt = matmul_dtype
    # fc1 / fc_delta[0]: stay f32 (tiny contractions, exact zero padded channels)
    w1 = _pad2(params["w1"], dpP, dmP)
    b1 = _pad2(params["b1"], 1, dmP)
    wd1 = _pad2(params["wd1"], 3, dmP)
    bd1 = _pad2(params["bd1"], 1, dmP)
    # heavy per-neighbour matmuls: weights in matmul_dtype (bf16 -> native MXU path)
    wq = _pad2(params["wq"], dmP, dmP).astype(wdt)
    wk = _pad2(params["wk"], dmP, dmP).astype(wdt)
    wv = _pad2(params["wv"], dmP, dmP).astype(wdt)
    wd2 = _pad2(params["wd2"], dmP, dmP).astype(wdt)
    bd2 = _pad2(params["bd2"], 1, dmP)
    wg1 = _pad2(params["wg1"], dmP, dmP).astype(wdt)
    bg1 = _pad2(params["bg1"], 1, dmP)
    # softmax scale folded into fc_gamma[1] (LeakyReLU is positively homogeneous)
    wg2 = (_pad2(params["wg2"], dmP, dmP) * scale).astype(wdt)
    bg2 = _pad2(params["bg2"], 1, dmP) * scale
    w2 = _pad2(params["w2"], dmP, dpP).astype(wdt)
    b2 = _pad2(params["b2"], 1, dpP)

    # lane-dense residual (padded channels stay exactly zero end-to-end)
    featsP = jnp.pad(feats, ((0, 0), (0, 0), (0, dpP - d_points)))

    # -------- kernel 1: fused per-point table --------
    dmap1 = lambda b_, t_: (b_, t_, 0)
    wmap1 = lambda b_, t_: (0, 0)
    xf = pl.pallas_call(
        functools.partial(proj_kernel, d_points=d_points, dmP=dmP),
        out_shape=jax.ShapeDtypeStruct((B, N, 2 * dmP), f32),
        grid_spec=pltpu.PrefetchScalarGridSpec(
            num_scalar_prefetch=0,
            grid=(B, T),
            in_specs=[
                pl.BlockSpec((None, TILE_N, dpP), dmap1),
                pl.BlockSpec((None, TILE_N, 3), dmap1),
                pl.BlockSpec(w1.shape, wmap1), pl.BlockSpec(b1.shape, wmap1),
                pl.BlockSpec(wd1.shape, wmap1),
            ],
            out_specs=pl.BlockSpec((None, TILE_N, 2 * dmP), dmap1),
        ),
        compiler_params=pltpu.CompilerParams(
            dimension_semantics=("parallel", "parallel")),
    )(featsP, pos, w1, b1, wd1)

    # -------- kernel 2: gather + attention + fc2 + residual --------
    table_bytes = N * 2 * dmP * 4
    tile_inter = TILE_N * K * dmP * 4
    need = 2 * table_bytes + 16 * tile_inter + (16 << 20)
    cap = max(32 << 20, min(phys_vmem - (8 << 20), 100 << 20))
    vmem_limit = int(min(max(need, 48 << 20), cap))

    weight_args = (wq, wk, wv, bd1, wd2, bd2, wg1, bg1, wg2, bg2, w2, b2)

    if N <= onehot_max_n:
        # Small point clouds: one-hot MXU gather (no per-neighbour scalar loop).
        dmap = lambda b_, t_: (b_, t_, 0)
        fmap = lambda b_, t_: (b_, 0, 0)
        wmap = lambda b_, t_: (0, 0)
        kern = functools.partial(attn_onehot_kernel, N=N, K=K, TILE_N=TILE_N, dmP=dmP)
        outP = pl.pallas_call(
            kern,
            out_shape=jax.ShapeDtypeStruct((B, N, dpP), f32),
            grid_spec=pltpu.PrefetchScalarGridSpec(
                num_scalar_prefetch=0,
                grid=(B, T),
                in_specs=[
                    pl.BlockSpec((None, TILE_N, K), dmap),       # knn indices (VMEM)
                    pl.BlockSpec((None, TILE_N, dpP), dmap),     # residual feats
                    pl.BlockSpec((None, N, 2 * dmP), fmap),      # fused table (resident)
                    *[pl.BlockSpec(w.shape, wmap) for w in weight_args],
                ],
                out_specs=pl.BlockSpec((None, TILE_N, dpP), dmap),
            ),
            compiler_params=pltpu.CompilerParams(
                dimension_semantics=("parallel", "parallel"),
                vmem_limit_bytes=vmem_limit),
        )(knn_idx.astype(jnp.int32), featsP, xf, *weight_args)
    else:
        # Large point clouds: SMEM-index row gather from the resident fused table.
        idx_flat = knn_idx.astype(jnp.int32).reshape(B * N * K)
        dmap = lambda b_, t_, idx: (b_, t_, 0)
        fmap = lambda b_, t_, idx: (b_, 0, 0)
        wmap = lambda b_, t_, idx: (0, 0)
        if table_bytes > (8 << 20):
            # index_map is constant over the tile axis -> a second buffer only
            # doubles the footprint (matters on v7x's 64 MiB VMEM).
            table_spec = pl.BlockSpec((None, N, 2 * dmP), fmap,
                                      pipeline_mode=pl.Buffered(1))
        else:
            table_spec = pl.BlockSpec((None, N, 2 * dmP), fmap)
        kern = functools.partial(attn_gather_kernel, N=N, K=K, TILE_N=TILE_N, dmP=dmP)
        outP = pl.pallas_call(
            kern,
            out_shape=jax.ShapeDtypeStruct((B, N, dpP), f32),
            grid_spec=pltpu.PrefetchScalarGridSpec(
                num_scalar_prefetch=1,
                grid=(B, T),
                in_specs=[
                    pl.BlockSpec((None, TILE_N, dpP), dmap),     # residual feats
                    table_spec,                                  # fused table (resident)
                    *[pl.BlockSpec(w.shape, wmap) for w in weight_args],
                ],
                out_specs=pl.BlockSpec((None, TILE_N, dpP), dmap),
                scratch_shapes=[pltpu.VMEM((TILE_N, K, 2 * dmP), f32)],
            ),
            compiler_params=pltpu.CompilerParams(
                dimension_semantics=("parallel", "parallel"),
                vmem_limit_bytes=vmem_limit),
        )(idx_flat, featsP, xf, *weight_args)

    return outP[:, :, :d_points]


# ---------------- parameter setup (deterministic, synthetic) ----------------

def fused_conv_bn_params(key, c_in, c_out, eps=1e-5):
    # 1x1 conv (no bias) + BatchNorm folded in inference mode.
    # TODO(synk): training-mode BatchNorm batch statistics are not reproduced;
    # BN uses deterministic running stats (mean=0, var=1) folded into the conv.
    kw, kg, kb = jax.random.split(key, 3)
    w = jax.random.normal(kw, (c_in, c_out), jnp.float32) / np.sqrt(c_in)
    gamma = 1.0 + 0.1 * jax.random.normal(kg, (c_out,), jnp.float32)
    beta = 0.1 * jax.random.normal(kb, (c_out,), jnp.float32)
    running_mean = jnp.zeros((c_out,), jnp.float32)
    running_var = jnp.ones((c_out,), jnp.float32)
    s = gamma / jnp.sqrt(running_var + eps)
    return w * s[None, :], (beta - running_mean * s).reshape(1, c_out)


def init_params(key, d_points, d_model):
    keys = jax.random.split(key, 9)
    w1, b1 = fused_conv_bn_params(keys[0], d_points, d_model)        # fc1
    wd1, bd1 = fused_conv_bn_params(keys[1], 3, d_model)             # fc_delta[0]
    wd2, bd2 = fused_conv_bn_params(keys[2], d_model, d_model)       # fc_delta[1]
    wg1, bg1 = fused_conv_bn_params(keys[3], d_model, d_model)       # fc_gamma[0]
    wg2, bg2 = fused_conv_bn_params(keys[4], d_model, d_model)       # fc_gamma[1]
    w2, b2 = fused_conv_bn_params(keys[5], d_model, d_points)        # fc2
    wq = jax.random.normal(keys[6], (d_model, d_model), jnp.float32) / np.sqrt(d_model)
    wk = jax.random.normal(keys[7], (d_model, d_model), jnp.float32) / np.sqrt(d_model)
    wv = jax.random.normal(keys[8], (d_model, d_model), jnp.float32) / np.sqrt(d_model)
    return dict(w1=w1, b1=b1, wq=wq, wk=wk, wv=wv,
                wd1=wd1, bd1=bd1, wd2=wd2, bd2=bd2,
                wg1=wg1, bg1=bg1, wg2=wg2, bg2=bg2, w2=w2, b2=b2)


# ---------------- glue: kNN indices + pure-JAX reference ----------------

def knn_indices(pos, k):
    # pos: (B, N, 3).  Nearest k neighbours (includes self), plain XLA argsort.
    d2 = jnp.sum((pos[:, :, None, :] - pos[:, None, :, :]) ** 2, axis=-1)
    return jnp.argsort(d2, axis=-1)[:, :, :k].astype(jnp.int32)


def reference(feats, pos, knn_idx, params):
    x = _leaky(feats @ params["w1"] + params["b1"])
    q = x @ params["wq"]
    kf = x @ params["wk"]
    vf = x @ params["wv"]
    gather = jax.vmap(lambda a, i: a[i])          # (N,C),(N,K) -> (N,K,C), over batch
    k_nb = gather(kf, knn_idx)
    v_nb = gather(vf, knn_idx)
    pos_nb = gather(pos, knn_idx)
    rel = pos[:, :, None, :] - pos_nb
    pe = _leaky(_leaky(rel @ params["wd1"] + params["bd1"]) @ params["wd2"] + params["bd2"])
    ai = q[:, :, None, :] - k_nb + pe
    logits = _leaky(_leaky(ai @ params["wg1"] + params["bg1"]) @ params["wg2"] + params["bg2"])
    N = feats.shape[1]
    attn = jax.nn.softmax(logits / np.sqrt(N), axis=2)   # softmax over neighbour dim
    res = jnp.sum(attn * (v_nb + pe), axis=2)
    return _leaky(res @ params["w2"] + params["b2"]) + feats


if __name__ == "__main__":
    def run_case(case_key, B, N, d_points, d_model, K):
        kf_, kp_, kw_ = jax.random.split(case_key, 3)
        feats = jax.random.normal(kf_, (B, N, d_points), jnp.float32)
        pos = jax.random.normal(kp_, (B, N, 3), jnp.float32)
        params = init_params(kw_, d_points, d_model)
        knn_idx = knn_indices(pos, K)
        out = jax.block_until_ready(point_transformer_block(feats, pos, knn_idx, params))
        ref = reference(feats, pos, knn_idx, params)
        err = float(np.max(np.abs(np.asarray(out) - np.asarray(ref))))
        # bf16 MXU operands (per perf review) against an f32 reference -> relaxed
        # tolerance; pass matmul_dtype=jnp.float32 for ~1e-5 parity.
        ok = bool(np.allclose(np.asarray(out), np.asarray(ref), rtol=5e-2, atol=5e-2))
        return ok, err

    root = jax.random.PRNGKey(0)
    key_small, key_large = jax.random.split(root)
    # small-N path: one-hot MXU gather
    ok1, err1 = run_case(key_small, B=2, N=16, d_points=4, d_model=32, K=8)
    # large-N path: multi-tile grid + SMEM-index row gather from the resident table
    ok2, err2 = run_case(key_large, B=1, N=1024, d_points=8, d_model=64, K=16)
    if not (ok1 and ok2):
        raise AssertionError(
            "Pallas kernel mismatch vs JAX reference: "
            f"small-N max_abs_err={err1:.5f} (ok={ok1}), "
            f"large-N max_abs_err={err2:.5f} (ok={ok2})")
    print("KERNEL_OK")
</pallas_src>

<mosaic_0001>
module attributes {stable_mosaic.version = 11 : i64} {
  func.func @proj_kernel(%arg0: i32, %arg1: i32, %arg2: memref<1x16x128xf32, #tpu.memory_space<vmem>>, %arg3: memref<1x16x3xf32, #tpu.memory_space<vmem>>, %arg4: memref<128x128xf32, #tpu.memory_space<vmem>>, %arg5: memref<1x128xf32, #tpu.memory_space<vmem>>, %arg6: memref<3x128xf32, #tpu.memory_space<vmem>>, %arg7: memref<1x16x256xf32, #tpu.memory_space<vmem>>) attributes {dimension_semantics = [#tpu.dimension_semantics<parallel>, #tpu.dimension_semantics<parallel>], iteration_bounds = array<i64: 2, 1>, scalar_prefetch = 0 : i64, scratch_operands = 0 : i64, tpu.core_type = #tpu.core_type<tc>, window_params = [{transform_indices = @transform_0, window_bounds = array<i64: 1, 16, 128>}, {transform_indices = @transform_1, window_bounds = array<i64: 1, 16, 3>}, {pipeline_mode = #tpu.pipeline_mode<synchronous>, transform_indices = @transform_2, window_bounds = array<i64: 128, 128>}, {pipeline_mode = #tpu.pipeline_mode<synchronous>, transform_indices = @transform_3, window_bounds = array<i64: 1, 128>}, {pipeline_mode = #tpu.pipeline_mode<synchronous>, transform_indices = @transform_4, window_bounds = array<i64: 3, 128>}, {transform_indices = @transform_5, window_bounds = array<i64: 1, 16, 256>}]} {
    %c0 = arith.constant 0 : index
    %c0_0 = arith.constant 0 : index
    %c0_1 = arith.constant 0 : index
    %0 = vector.load %arg2[%c0, %c0_0, %c0_1] : memref<1x16x128xf32, #tpu.memory_space<vmem>>, vector<1x16x128xf32>
    %1 = vector.shape_cast %0 : vector<1x16x128xf32> to vector<16x128xf32>
    %c0_2 = arith.constant 0 : index
    %c0_3 = arith.constant 0 : index
    %2 = vector.load %arg4[%c0_2, %c0_3] : memref<128x128xf32, #tpu.memory_space<vmem>>, vector<128x128xf32>
    %3 = vector.extract_strided_slice %1 {offsets = [0, 0], sizes = [16, 1], strides = [1, 1]} : vector<16x128xf32> to vector<16x1xf32>
    %4 = vector.extract_strided_slice %2 {offsets = [0, 0], sizes = [1, 128], strides = [1, 1]} : vector<128x128xf32> to vector<1x128xf32>
    %5 = vector.broadcast %3 : vector<16x1xf32> to vector<16x128xf32>
    %6 = vector.broadcast %4 : vector<1x128xf32> to vector<16x128xf32>
    %7 = arith.mulf %5, %6 : vector<16x128xf32>
    %8 = vector.extract_strided_slice %1 {offsets = [0, 1], sizes = [16, 1], strides = [1, 1]} : vector<16x128xf32> to vector<16x1xf32>
    %9 = vector.extract_strided_slice %2 {offsets = [1, 0], sizes = [1, 128], strides = [1, 1]} : vector<128x128xf32> to vector<1x128xf32>
    %10 = vector.broadcast %8 : vector<16x1xf32> to vector<16x128xf32>
    %11 = vector.broadcast %9 : vector<1x128xf32> to vector<16x128xf32>
    %12 = arith.mulf %10, %11 : vector<16x128xf32>
    %13 = arith.addf %7, %12 : vector<16x128xf32>
    %14 = vector.extract_strided_slice %1 {offsets = [0, 2], sizes = [16, 1], strides = [1, 1]} : vector<16x128xf32> to vector<16x1xf32>
    %15 = vector.extract_strided_slice %2 {offsets = [2, 0], sizes = [1, 128], strides = [1, 1]} : vector<128x128xf32> to vector<1x128xf32>
    %16 = vector.broadcast %14 : vector<16x1xf32> to vector<16x128xf32>
    %17 = vector.broadcast %15 : vector<1x128xf32> to vector<16x128xf32>
    %18 = arith.mulf %16, %17 : vector<16x128xf32>
    %19 = arith.addf %13, %18 : vector<16x128xf32>
    %20 = vector.extract_strided_slice %1 {offsets = [0, 3], sizes = [16, 1], strides = [1, 1]} : vector<16x128xf32> to vector<16x1xf32>
    %21 = vector.extract_strided_slice %2 {offsets = [3, 0], sizes = [1, 128], strides = [1, 1]} : vector<128x128xf32> to vector<1x128xf32>
    %22 = vector.broadcast %20 : vector<16x1xf32> to vector<16x128xf32>
    %23 = vector.broadcast %21 : vector<1x128xf32> to vector<16x128xf32>
    %24 = arith.mulf %22, %23 : vector<16x128xf32>
    %25 = arith.addf %19, %24 : vector<16x128xf32>
    %c0_4 = arith.constant 0 : index
    %c0_5 = arith.constant 0 : index
    %26 = vector.load %arg5[%c0_4, %c0_5] : memref<1x128xf32, #tpu.memory_space<vmem>>, vector<1x128xf32>
    %27 = vector.broadcast %26 : vector<1x128xf32> to vector<16x128xf32>
    %28 = arith.addf %25, %27 : vector<16x128xf32>
    %cst = arith.constant 0.000000e+00 : f32
    %29 = vector.broadcast %cst : f32 to vector<16x128xf32>
    %30 = arith.cmpf oge, %28, %29 : vector<16x128xf32>
    %cst_6 = arith.constant 2.000000e-01 : f32
    %31 = vector.broadcast %cst_6 : f32 to vector<16x128xf32>
    %32 = arith.mulf %31, %28 : vector<16x128xf32>
    %33 = arith.select %30, %28, %32 : vector<16x128xi1>, vector<16x128xf32>
    %c0_7 = arith.constant 0 : index
    %c0_8 = arith.constant 0 : index
    %c0_9 = arith.constant 0 : index
    %34 = vector.load %arg3[%c0_7, %c0_8, %c0_9] : memref<1x16x3xf32, #tpu.memory_space<vmem>>, vector<1x16x3xf32>
    %35 = vector.shape_cast %34 : vector<1x16x3xf32> to vector<16x3xf32>
    %c0_10 = arith.constant 0 : index
    %c0_11 = arith.constant 0 : index
    %36 = vector.load %arg6[%c0_10, %c0_11] : memref<3x128xf32, #tpu.memory_space<vmem>>, vector<3x128xf32>
    %37 = vector.extract_strided_slice %35 {offsets = [0, 0], sizes = [16, 1], strides = [1, 1]} : vector<16x3xf32> to vector<16x1xf32>
    %38 = vector.extract_strided_slice %36 {offsets = [0, 0], sizes = [1, 128], strides = [1, 1]} : vector<3x128xf32> to vector<1x128xf32>
    %39 = vector.broadcast %37 : vector<16x1xf32> to vector<16x128xf32>
    %40 = vector.broadcast %38 : vector<1x128xf32> to vector<16x128xf32>
    %41 = arith.mulf %39, %40 : vector<16x128xf32>
    %42 = vector.extract_strided_slice %35 {offsets = [0, 1], sizes = [16, 1], strides = [1, 1]} : vector<16x3xf32> to vector<16x1xf32>
    %43 = vector.extract_strided_slice %36 {offsets = [1, 0], sizes = [1, 128], strides = [1, 1]} : vector<3x128xf32> to vector<1x128xf32>
    %44 = vector.broadcast %42 : vector<16x1xf32> to vector<16x128xf32>
    %45 = vector.broadcast %43 : vector<1x128xf32> to vector<16x128xf32>
    %46 = arith.mulf %44, %45 : vector<16x128xf32>
    %47 = arith.addf %41, %46 : vector<16x128xf32>
    %48 = vector.extract_strided_slice %35 {offsets = [0, 2], sizes = [16, 1], strides = [1, 1]} : vector<16x3xf32> to vector<16x1xf32>
    %49 = vector.extract_strided_slice %36 {offsets = [2, 0], sizes = [1, 128], strides = [1, 1]} : vector<3x128xf32> to vector<1x128xf32>
    %50 = vector.broadcast %48 : vector<16x1xf32> to vector<16x128xf32>
    %51 = vector.broadcast %49 : vector<1x128xf32> to vector<16x128xf32>
    %52 = arith.mulf %50, %51 : vector<16x128xf32>
    %53 = arith.addf %47, %52 : vector<16x128xf32>
    %c0_12 = arith.constant 0 : index
    %c0_13 = arith.constant 0 : index
    %c0_14 = arith.constant 0 : index
    %54 = vector.load %arg7[%c0_12, %c0_13, %c0_14] : memref<1x16x256xf32, #tpu.memory_space<vmem>>, vector<1x16x128xf32>
    %55 = vector.shape_cast %54 : vector<1x16x128xf32> to vector<16x128xf32>
    %56 = vector.shape_cast %33 : vector<16x128xf32> to vector<1x16x128xf32>
    tpu.vector_store %arg7[%c0_12, %c0_13, %c0_14], %56 {strides = array<i32>} : memref<1x16x256xf32, #tpu.memory_space<vmem>>, vector<1x16x128xf32>,
    %c0_15 = arith.constant 0 : index
    %c0_16 = arith.constant 0 : index
    %c128 = arith.constant 128 : index
    %57 = vector.load %arg7[%c0_15, %c0_16, %c128] : memref<1x16x256xf32, #tpu.memory_space<vmem>>, vector<1x16x128xf32>
    %58 = vector.shape_cast %57 : vector<1x16x128xf32> to vector<16x128xf32>
    %59 = vector.shape_cast %53 : vector<16x128xf32> to vector<1x16x128xf32>
    tpu.vector_store %arg7[%c0_15, %c0_16, %c128], %59 {strides = array<i32>} : memref<1x16x256xf32, #tpu.memory_space<vmem>>, vector<1x16x128xf32>,
    return
  }
  func.func @transform_0(%arg0: i32, %arg1: i32) -> (i32, i32, i32) {
    %c0_i32 = arith.constant 0 : i32
    %c0_i32_0 = arith.constant 0 : i32
    return %arg0, %arg1, %c0_i32 : i32, i32, i32
  }
  func.func @transform_1(%arg0: i32, %arg1: i32) -> (i32, i32, i32) {
    %c0_i32 = arith.constant 0 : i32
    %c0_i32_0 = arith.constant 0 : i32
    return %arg0, %arg1, %c0_i32 : i32, i32, i32
  }
  func.func @transform_2(%arg0: i32, %arg1: i32) -> (i32, i32) {
    %c0_i32 = arith.constant 0 : i32
    %c0_i32_0 = arith.constant 0 : i32
    %c0_i32_1 = arith.constant 0 : i32
    return %c0_i32, %c0_i32_0 : i32, i32
  }
  func.func @transform_3(%arg0: i32, %arg1: i32) -> (i32, i32) {
    %c0_i32 = arith.constant 0 : i32
    %c0_i32_0 = arith.constant 0 : i32
    %c0_i32_1 = arith.constant 0 : i32
    return %c0_i32, %c0_i32_0 : i32, i32
  }
  func.func @transform_4(%arg0: i32, %arg1: i32) -> (i32, i32) {
    %c0_i32 = arith.constant 0 : i32
    %c0_i32_0 = arith.constant 0 : i32
    %c0_i32_1 = arith.constant 0 : i32
    return %c0_i32, %c0_i32_0 : i32, i32
  }
  func.func @transform_5(%arg0: i32, %arg1: i32) -> (i32, i32, i32) {
    %c0_i32 = arith.constant 0 : i32
    %c0_i32_0 = arith.constant 0 : i32
    return %arg0, %arg1, %c0_i32 : i32, i32, i32
  }
}

</mosaic_0001>

<bundles_post_ra>
// kernel: tpu_custom_call.1
= control target key start
LH: loop header
LB: loop body
LE: loop exit
PB: predicated region body
PF: predicated region fallthrough
CT: control target
= control target key end

     0   :  { %10 = vsyncpa [#allocation3], 0  ;;  %s970_s0 = inlined_call_operand.vmem [shape: f32[2,16,128], index: 0, kind: input, shape index: {}]   ;;  %s971_s1 = inlined_call_operand.vmem [shape: f32[2,16,3], index: 1, kind: input, shape index: {}]   ;;  %s972_s2 = inlined_call_operand.hbm [shape: f32[128,128], index: 2, kind: input, shape index: {}]   ;;  %s973_s3 = inlined_call_operand.vmem [shape: f32[1,128], index: 3, kind: input, shape index: {}]   ;;  %s974_s4 = inlined_call_operand.vmem [shape: f32[3,128], index: 4, kind: input, shape index: {}]   ;;  %s975_s5 = inlined_call_operand.hbm [shape: f32[2,16,256], index: 5, kind: output, shape index: {}]  }
   0x1   :  { %11 = vsyncpa [#allocation4], 0 }
   0x2   :  { %13 = vsyncpa [#allocation4 + $0x1], 0  ;;  %s822_s18 = smov 0   ;;  %s824_s19 = smov 0  }
   0x3   :  { %s826_s20 = smov 0   ;;  %s828_s21 = smov 0  }
   0x4   :  { %s830_s22 = smov 0   ;;  %s832_s23 = smov 0  }
   0x5 LB: > { %s568_s24 = sadd.s32 4294967295, %s780_s23   ;;  %s569_s25 = sadd.s32 4294967294, %s780_s23   ;;  %s780_s23 = sphi %s832_s23, %s19_s23   ;;  %s776_s22 = sphi %s830_s22, %s984_s22   ;;  %s772_s21 = sphi %s828_s21, %s983_s21   ;;  %s768_s20 = sphi %s826_s20, %s982_s20   ;;  %s764_s19 = sphi %s824_s19, %s981_s19   ;;  %s760_s18 = sphi %s822_s18, %s980_s18  }
   0x6   : > { %s31_s26 = sadd.s32 1, %s776_s22  ;;  %s159_s27 = sadd.s32 1, %s768_s20 }
   0x7   : > { %p33_p0 = scmp.ge.s32.totalorder %s31_s26, 2  ;;  %p169_p1 = scmp.ne.s32.totalorder %s768_s20, %s764_s19 }
   0x8   : > { %p170_p2 = scmp.eq.s32.totalorder %s568_s24, 1  ;;  %p175_p3 = scmp.ne.s32.totalorder %s764_s19, %s760_s18 }
   0x9   : > { %s986_s26 = smov (%p33_p0, %s31_s26), 0  ;;  %p176_p5 = scmp.eq.s32.totalorder %s569_s25, 1 }
   0xa   : > { %p862_p4 = por %p170_p2, %p169_p1  ;;  %s154_s29 = ssub.s32 %s776_s22, %s986_s26 }
   0xb   : > { %p570_p6 = scmp.ge.s32.totalorder %s780_s23, 1  ;;  %p157_p7 = scmp.eq.s32.totalorder %s154_s29, 0 }
   0xc   : > { %p869_p8 = por %p176_p5, %p175_p3  ;;  %p183_p9 = scmp.lt.s32.totalorder %s780_s23, 3 }
   0xd   : > { %s875_s6 = scalar_select %p157_p7, %s768_s20, %s159_s27  }
   0xe   : > { %p877_p10 = pnand %p570_p6, %p183_p9  ;;  %p881_p11 = scmp.eq.s32.totalorder %s568_s24, 0 }
   0xf   : > { %s782_s9 = smov [#allocation2]  }
  0x10   : > { %p595_p12 = pneg %p877_p10  ;;  %s195_s10 = sshll.u32 %s782_s9, 4  ;;  %s196_s10 = int_to_ptr.vmem [resolvable:$true] %s195_s10 }
  0x11   : > { %s685_s11 = scalar_lea.vmem %s196_s10, 2048  ;;  %p693_p5 = scmp.lt.s32.totalorder %s196_s10, %s196_s10 }
  0x12   : > { %p596_p13 = pnand %p881_p11, %p595_p12  ;;  %p686_p1 = scmp.ne.s32.totalorder %s196_s10, %s685_s11 }
  0x13   : > { %p694_p6 = scmp.lt.s32.totalorder %s685_s11, %s685_s11 }
  0x14   : > { %p676_p0 = pneg %p596_p13 }
  0x15   : > { %p695_p7 = por %p694_p6, %p693_p5 }
  0x16   : > { %p688_p2 = pnand %p686_p1, %p676_p0 }
  0x18   : > { %p689_p3 = pneg %p688_p2 }
  0x1a   : > { %p696_p9 = pnand %p695_p7, %p689_p3 }
  0x1c   : > { %699 = shalt.err (!%p696_p9)
}
  0x1d   : > { %s783_s12 = smov 128   ;;  %s784_s13 = smov 8  }
  0x1e   : > { %598 = dma.hbm_to_vmem [thread:$0]  (!%p596_p13), %s972_s2, 2048, %s196_s10, [#allocation3], %s783_s12, %s783_s12, %s784_s13  }
  0x1f   : > { %243 = sbr.rel (%p877_p10) target bundleno = 219 (0xdb), region = 40 }
  0x24   : > { %751 = dma.done.wait (%p881_p11), [#allocation3], 2048  }
  0x25   : > { %753 = vsyncadd (%p881_p11), [#allocation3], 4294965248  ;;  %p285_p12 = scmp.lt.s32.totalorder %s772_s21, 1  ;;  %v785_v0 = vmov 1   ;;  %v786_v1 = vmov 0   ;;  %v787_v4 = vmov 2   ;;  %v318_v8 = vlaneseq }
  0x26   : > { %664 = vset.pattern.permute.xlu1 %v785_v0  ;;  %663 = vset.pattern.permute.xlu0 %v786_v1  ;;  %v788_v5 = vmov 3   ;;  %v307_v14 = vld [vmem:[#allocation2] sm:$0xff]  ;;  %s281_s9 = sand.u32 1, %s764_s19   ;;  %s789_s7 = smov [#allocation5]  }
  0x27   : > { %s286_s16 = scalar_select %p285_p12, %s772_s21, 1  ;;  %v319_v9 = vshrl.u32 %v318_v8, 7  ;;  %v580_v39 = vld [vmem:[%s973_s3] ss:$0 sm:$0xff] }
  0x28   : > { %s575_s12 = sshll.u32 %s281_s9, 5  ;;  %v389_v50 = vld [vmem:[%s974_s4] sm:$0x7]  ;;  %s925_s29 = scalar_lea.sflag [#allocation4], %s281_s9 }
  0x29   : > { %s586_s17 = sshll.u32 %s286_s16, 4  ;;  %v334_v12 = vsub.s32 1, %v319_v9  ;;  %v320_v13 = vsub.s32 0, %v319_v9  ;;  %v350_v15 = vsub.s32 2, %v319_v9  ;;  %v366_v21 = vsub.s32 3, %v319_v9  ;;  %s283_s15 = scalar_lea.vmem [#allocation5], %s575_s12 }
  0x2a   : > { %s292_s27 = scalar_lea.vmem %s970_s0, %s586_s17  ;;  %s302_s8 = scalar_lea.vmem %s971_s1, %s586_s17 }
  0x2b   : > { %v305_v2 = vld [vmem:[%s292_s27] sm:$0xff]  ;;  %v306_v3 = vld [vmem:[%s292_s27 + $0x8] sm:$0xff]  ;;  %v335_v18 = vrot.slane %v307_v14, %v334_v12  ;;  %v321_v19 = vrot.slane %v307_v14, %v320_v13  ;;  %v351_v20 = vrot.slane %v307_v14, %v350_v15  ;;  %v367_v30 = vrot.slane %v307_v14, %v366_v21  ;;  %s459_s16 = sshll.u32 %s283_s15, 4  ;;  %s588_s17 = sshll.u32 %s772_s21, 9  ;;  %s916_s16 = int_to_ptr.vmem [resolvable:$true] %s459_s16 }
  0x2c   : > { %325 = vperm.xlu1 %664, %v305_v2   ;;  %310 = vperm.xlu0 %663, %v305_v2   ;;  %v387_v6 = vld [vmem:[%s302_s8] sm:$0xff]  ;;  %v388_v7 = vld [vmem:[%s302_s8 + $0x8] sm:$0xff]  ;;  %v433_v52 = vrot.slane %v389_v50, %v350_v15  ;;  %v403_v53 = vrot.slane %v389_v50, %v320_v13  ;;  %v417_v54 = vrot.slane %v389_v50, %v334_v12  ;;  %s921_s27 = scalar_lea.hbm %s975_s5, %s588_s17  ;;  %s700_s21 = scalar_lea.vmem %s916_s16, 512 }
  0x2d   : > { %p701_p10 = scmp.ne.s32.totalorder %s916_s16, %s700_s21  ;;  %s704_s8 = sshll.u32 %s789_s7, 4  ;;  %s705_s8 = int_to_ptr.vmem [resolvable:$false] %s704_s8 }
  0x2e   : > { %s706_s10 = scalar_lea.vmem %s705_s8, 1024  ;;  %p707_p0 = scmp.lt.s32.totalorder %s916_s16, %s705_s8 }
  0x2f   : > { %p702_p11 = pnand %p701_p10, %p862_p4  ;;  %p708_p1 = scmp.lt.s32.totalorder %s706_s10, %s700_s21 }
  0x30   : > { %329 = vperm.xlu1 %664, %v306_v3   ;;  %315 = vperm.xlu0 %663, %v306_v3  }
  0x31   : > { %p703_p13 = pneg %p702_p11  ;;  %p709_p2 = por %p708_p1, %p707_p0 }
  0x33   : > { %p710_p3 = pnand %p709_p2, %p703_p13 }
  0x34   : > { %666 = vset.pattern.permute.xlu1 %v787_v4  ;;  %665 = vset.pattern.permute.xlu0 %v787_v4 }
  0x35   : > { %345 = vperm.xlu1 %666, %v306_v3   ;;  %341 = vperm.xlu0 %665, %v305_v2  }
  0x39   : > { %667 = vset.pattern.permute.xlu1 %v788_v5  ;;  %668 = vset.pattern.permute.xlu0 %v788_v5 }
  0x3a   : > { %357 = vperm.xlu1 %667, %v305_v2   ;;  %361 = vperm.xlu0 %668, %v306_v3  }
  0x3e   : > { %669 = vset.pattern.permute.xlu1 %v786_v1  ;;  %670 = vset.pattern.permute.xlu0 %v785_v0 }
  0x3f   : > { %392 = vperm.xlu1 %669, %v387_v6   ;;  %407 = vperm.xlu0 %670, %v387_v6  }
  0x43   : > { %397 = vperm.xlu1 %669, %v388_v7   ;;  %673 = vset.pattern.permute.xlu0 %v787_v4 }
  0x44   : > { %427 = vperm.xlu0 %673, %v388_v7  }
  0x47   : > { %671 = vset.pattern.permute.xlu1 %v785_v0 }
  0x48   : > { %411 = vperm.xlu1 %671, %v388_v7  }
  0x4c   : > { %672 = vset.pattern.permute.xlu1 %v787_v4 }
  0x4d   : > { %423 = vperm.xlu1 %672, %v387_v6  }
  0xa7   : > { %v326_v10 = vpop.permute.xlu1 %325  ;;  %v311_v11 = vpop.permute.xlu0 %310 }
  0xa8   : > { %v336_v22 = vmul.f32 %v335_v18, %v326_v10  ;;  %v322_v23 = vmul.f32 %v321_v19, %v311_v11 }
  0xaa   : > { %v338_v31 = vadd.f32 %v336_v22, %v322_v23 }
  0xab   : > { %v330_v16 = vpop.permute.xlu1 %329  ;;  %v316_v17 = vpop.permute.xlu0 %315 }
  0xac   : > { %v337_v24 = vmul.f32 %v335_v18, %v330_v16  ;;  %v323_v25 = vmul.f32 %v321_v19, %v316_v17 }
  0xae   : > { %v339_v32 = vadd.f32 %v337_v24, %v323_v25 }
  0xb0   : > { %v346_v26 = vpop.permute.xlu1 %345  ;;  %v342_v27 = vpop.permute.xlu0 %341 }
  0xb1   : > { %v353_v28 = vmul.f32 %v351_v20, %v346_v26  ;;  %v352_v29 = vmul.f32 %v351_v20, %v342_v27 }
  0xb3   : > { %v355_v35 = vadd.f32 %v353_v28, %v339_v32  ;;  %v354_v36 = vadd.f32 %v352_v29, %v338_v31 }
  0xb5   : > { %v358_v33 = vpop.permute.xlu1 %357  ;;  %v362_v34 = vpop.permute.xlu0 %361 }
  0xb6   : > { %v368_v37 = vmul.f32 %v367_v30, %v358_v33  ;;  %v369_v38 = vmul.f32 %v367_v30, %v362_v34 }
  0xb8   : > { %v370_v40 = vadd.f32 %v368_v37, %v354_v36  ;;  %v371_v41 = vadd.f32 %v369_v38, %v355_v35 }
  0xba   : > { %v379_v42 = vadd.f32 %v580_v39, %v370_v40  ;;  %v380_v43 = vadd.f32 %v580_v39, %v371_v41  ;;  %v393_v44 = vpop.permute.xlu1 %392  ;;  %v408_v47 = vpop.permute.xlu0 %407 }
  0xbb   : > { %v404_v60 = vmul.f32 %v403_v53, %v393_v44  ;;  %v418_v61 = vmul.f32 %v417_v54, %v408_v47 }
  0xbc   : > { %vm381_vm0 = vcmp.ge.f32.partialorder %v379_v42, 0.0  ;;  %v383_v45 = vmul.f32 0.2, %v379_v42  ;;  %vm382_vm1 = vcmp.ge.f32.partialorder %v380_v43, 0.0  ;;  %v384_v46 = vmul.f32 0.2, %v380_v43 }
  0xbd   : > { %v420_v1 = vadd.f32 %v418_v61, %v404_v60 }
  0xbe   : > { %v385_v48 = vsel %vm381_vm0, %v379_v42, %v383_v45  ;;  %v386_v49 = vsel %vm382_vm1, %v380_v43, %v384_v46  ;;  %v398_v51 = vpop.permute.xlu1 %397 }
  0xbf   : > { %438 = vst [vmem:[%s283_s15] sm:$0xff] %v385_v48  ;;  %439 = vst [vmem:[%s283_s15 + $0x10] sm:$0xff] %v386_v49  ;;  %v428_v55 = vpop.permute.xlu0 %427  ;;  %v405_v57 = vmul.f32 %v403_v53, %v398_v51 }
  0xc0   : > { %v435_v59 = vmul.f32 %v433_v52, %v428_v55 }
  0xc3   : > { %v412_v56 = vpop.permute.xlu1 %411 }
  0xc4   : > { %v419_v58 = vmul.f32 %v417_v54, %v412_v56 }
  0xc6   : > { %v421_v62 = vadd.f32 %v419_v58, %v405_v57 }
  0xc8   : > { %v437_v63 = vadd.f32 %v435_v59, %v421_v62  ;;  %v424_v0 = vpop.permute.xlu1 %423 }
  0xc9   : > { %v434_v2 = vmul.f32 %v433_v52, %v424_v0 }
  0xca   : > { %441 = vst [vmem:[%s283_s15 + $0x18] sm:$0xff] %v437_v63 }
  0xcb   : > { %v436_v3 = vadd.f32 %v434_v2, %v420_v1 }
  0xcd   : > { %440 = vst [vmem:[%s283_s15 + $0x8] sm:$0xff] %v436_v3 }
  0xce   : > { %713 = shalt.err (!%p710_p3)
}
  0xcf   : > { %s714_s9 = scalar_lea.hbm %s921_s27, 512  ;;  %s718_s13 = scalar_lea.hbm %s975_s5, 1024 }
  0xd0   : > { %p715_p5 = scmp.ne.s32.totalorder %s921_s27, %s714_s9  ;;  %p719_p9 = scmp.lt.s32.totalorder %s921_s27, %s975_s5 }
  0xd1   : > { %p720_p12 = scmp.lt.s32.totalorder %s718_s13, %s714_s9 }
  0xd2   : > { %p716_p6 = pnand %p715_p5, %p862_p4 }
  0xd3   : > { %p721_p10 = por %p720_p12, %p719_p9 }
  0xd4   : > { %p717_p7 = pneg %p716_p6 }
  0xd6   : > { %p722_p11 = pnand %p721_p10, %p717_p7 }
  0xd8   : > { %725 = shalt.err (!%p722_p11)
}
  0xd9   : > { %s790_s17 = smov 256   ;;  %s791_s24 = smov 16  }
  0xda   : > { %593 = dma.vmem_to_hbm [thread:$0]  (%p862_p4), %s916_s16, 512, %s921_s27, %s925_s29, %s790_s17, %s790_s17, %s791_s24  }
  0xdb PF: > { %p605_p13 = scmp.ge.s32.totalorder %s780_s23, 2  ;;  %s474_s25 = sand.u32 1, %s760_s18  }
  0xdc   : > { %s475_s21 = scalar_lea.sflag [#allocation4], %s474_s25 }
  0xdd   : > { %p600_p0 = pnand %p605_p13, %p869_p8 }
  0xdf   : > { %p601_p1 = pneg %p600_p0 }
  0xe1   : > { %755 = dma.done.wait (%p601_p1), %s475_s21, 512  }
  0xe2   : > { %757 = vsyncadd (%p601_p1), %s475_s21, 4294966784  ;;  %s19_s23 = sadd.s32 1, %s780_s23   ;;  %s980_s18 = smov %s764_s19 }
  0xe3   : > { %p16_p2 = scmp.ge.s32.totalorder %s19_s23, 4   ;;  %s981_s19 = smov %s768_s20 }
  0xe4   : > { %s982_s20 = smov %s875_s6  ;;  %s983_s21 = smov %s776_s22 }
  0xe5   : > { %s984_s22 = smov %s986_s26  ;;  %18 = sbr.rel (!%p16_p2) target bundleno = 5 (0x5), region = 83 }
  0xea   :  { %480 = vsyncpa [#allocation3], 1 }
  0xeb   :  { %482 = vsyncpa [#allocation3 + $0x1], 1 }
  0xec   :  { %483 = vsyncpa [#allocation4], 1 }
  0xed   :  { %485 = vsyncpa [#allocation4 + $0x1], 1 }

</bundles_post_ra>
